<compile_context>
chip_gen: v7x
topology: tpu7x:2x2x1
jax: 0.10.0
libtpu: 0.0.40
codegen_flags: <defaults>
</compile_context>

<pallas_src>
import jax
import jax.numpy as jnp
from jax.experimental import pallas as pl
from jax.experimental.pallas import tpu as pltpu


# ---------------------------------------------------------------------------
# helpers
# ---------------------------------------------------------------------------
def _round_up(x: int, m: int) -> int:
    return (x + m - 1) // m * m


def _vmem_budget_bytes() -> int:
    """Half of the local chip's physical VMEM (conservative 64 MiB fallback ~ v7x)."""
    cap = 64 * 1024 * 1024
    try:
        cap = int(getattr(pltpu.get_tpu_info(), "vmem_capacity_bytes", cap))
    except Exception:
        pass
    return max(cap // 2, 16 * 1024 * 1024)


# ---------------------------------------------------------------------------
# kernels
# ---------------------------------------------------------------------------
def _softmax_kernel(x_ref, o_ref):
    """Single-pass: the whole reduction column (N, TILE_D) is resident in VMEM."""
    x = x_ref[...].astype(jnp.float32)                        # f32 math (v5e has no bf16 VPU/EUP)
    x_max = jnp.max(x, axis=0, keepdims=True)                 # torch.max(x, dim=0, keepdims=True)
    # Stash exp(x - max) straight into the output tile -> no extra tile-sized temp.
    o_ref[...] = jnp.exp(x - x_max).astype(o_ref.dtype)
    denom = jnp.sum(o_ref[...].astype(jnp.float32), axis=0, keepdims=True)
    inv = pl.reciprocal(denom, approx=False)                  # exact: keep 1e-6 parity with torch
    o_ref[...] = (o_ref[...].astype(jnp.float32) * inv).astype(o_ref.dtype)


def _stats_kernel(x_ref, m_ref, l_ref, m_sc, l_sc):
    """Two-pass, pass 1: online per-column max and rescaled sum of exp over N tiles."""
    i = pl.program_id(1)

    @pl.when(i == 0)
    def _():
        m_sc[...] = jnp.full_like(m_sc, -jnp.inf)
        l_sc[...] = jnp.zeros_like(l_sc)

    x = x_ref[...].astype(jnp.float32)
    m_new = jnp.maximum(m_sc[...], jnp.max(x, axis=0, keepdims=True))
    l_sc[...] = (l_sc[...] * jnp.exp(m_sc[...] - m_new)
                 + jnp.sum(jnp.exp(x - m_new), axis=0, keepdims=True))
    m_sc[...] = m_new

    @pl.when(i == pl.num_programs(1) - 1)
    def _():
        m_ref[...] = m_sc[...]
        l_ref[...] = l_sc[...]


def _normalize_kernel(x_ref, m_ref, l_ref, o_ref):
    """Two-pass, pass 2: elementwise exp(x - max) / sum."""
    x = x_ref[...].astype(jnp.float32)
    inv = pl.reciprocal(l_ref[...], approx=False)
    o_ref[...] = (jnp.exp(x - m_ref[...]) * inv).astype(o_ref.dtype)


# ---------------------------------------------------------------------------
# pallas_call wrappers
# ---------------------------------------------------------------------------
def _single_pass(x, n, d_pad, tile_d, vmem_limit):
    grid = (pl.cdiv(d_pad, tile_d),)
    return pl.pallas_call(
        _softmax_kernel,
        out_shape=jax.ShapeDtypeStruct((n, d_pad), x.dtype),
        grid_spec=pltpu.PrefetchScalarGridSpec(
            num_scalar_prefetch=0,
            grid=grid,
            in_specs=[pl.BlockSpec((n, tile_d), lambda j: (0, j))],
            out_specs=pl.BlockSpec((n, tile_d), lambda j: (0, j)),
        ),
        compiler_params=pltpu.CompilerParams(
            dimension_semantics=("parallel",),
            vmem_limit_bytes=vmem_limit,
        ),
    )(x)


def _two_pass(x, n_pad, d_pad, tile_n, tile_d, vmem_limit):
    d_tiles = pl.cdiv(d_pad, tile_d)
    n_tiles = n_pad // tile_n

    # Pass 1: per-column (max, rescaled sum of exp) with an online accumulator over N.
    m, l = pl.pallas_call(
        _stats_kernel,
        out_shape=(jax.ShapeDtypeStruct((1, d_pad), jnp.float32),
                   jax.ShapeDtypeStruct((1, d_pad), jnp.float32)),
        grid_spec=pltpu.PrefetchScalarGridSpec(
            num_scalar_prefetch=0,
            grid=(d_tiles, n_tiles),
            in_specs=[pl.BlockSpec((tile_n, tile_d), lambda j, i: (i, j))],
            out_specs=[pl.BlockSpec((1, tile_d), lambda j, i: (0, j)),
                       pl.BlockSpec((1, tile_d), lambda j, i: (0, j))],
            scratch_shapes=[pltpu.VMEM((1, tile_d), jnp.float32),
                            pltpu.VMEM((1, tile_d), jnp.float32)],
        ),
        compiler_params=pltpu.CompilerParams(
            dimension_semantics=("parallel", "arbitrary"),
            vmem_limit_bytes=vmem_limit,
        ),
    )(x)

    # Pass 2: elementwise normalize.
    return pl.pallas_call(
        _normalize_kernel,
        out_shape=jax.ShapeDtypeStruct((n_pad, d_pad), x.dtype),
        grid_spec=pltpu.PrefetchScalarGridSpec(
            num_scalar_prefetch=0,
            grid=(d_tiles, n_tiles),
            in_specs=[pl.BlockSpec((tile_n, tile_d), lambda j, i: (i, j)),
                      pl.BlockSpec((1, tile_d), lambda j, i: (0, j)),
                      pl.BlockSpec((1, tile_d), lambda j, i: (0, j))],
            out_specs=pl.BlockSpec((tile_n, tile_d), lambda j, i: (i, j)),
        ),
        compiler_params=pltpu.CompilerParams(
            dimension_semantics=("parallel", "parallel"),
            vmem_limit_bytes=vmem_limit,
        ),
    )(x, m, l)


# ---------------------------------------------------------------------------
# public entry point
# ---------------------------------------------------------------------------
def softmax_stable(x: jax.Array, *, tile_d: int | None = None,
                   tile_n: int = 512, force_two_pass: bool = False) -> jax.Array:
    """Numerically stable softmax over axis 0 (torch dim=0) as Pallas TPU kernels."""
    orig_shape = x.shape
    x2 = x[:, None] if x.ndim == 1 else x.reshape(x.shape[0], -1)
    n, d = x2.shape
    in_bytes = x2.dtype.itemsize

    budget = _vmem_budget_bytes()
    d_pad = _round_up(d, 128)

    # Per-lane-column VMEM footprint of the single-pass kernel:
    # double-buffered input + double-buffered output + f32 temps.
    per_col_1p = n * (4 * in_bytes + 2 * 4) + 16
    use_two_pass = force_two_pass or (per_col_1p * 128 > budget)

    if not use_two_pass:
        td = tile_d
        if td is None:
            td = max(128, (budget // per_col_1p) // 128 * 128)
        td = min(td, d_pad)
        # Keep >= 2 grid steps on large inputs so v7x megacore can shard the D axis.
        if n * d_pad * in_bytes > (4 << 20) and d_pad >= 256 and td >= d_pad:
            td = max(128, (d_pad // 2) // 128 * 128)
        xp = jnp.pad(x2, ((0, 0), (0, d_pad - d))) if d_pad != d else x2
        out = _single_pass(xp, n, d_pad, td, budget)
        out = out[:, :d]
    else:
        # Tall-N path: online (max, sum) over N tiles, then normalize.
        tn = min(_round_up(min(tile_n, n), 8), _round_up(n, 8))
        per_col_2p = tn * (4 * in_bytes + 2 * 4) + 64
        td = tile_d
        if td is None:
            td = max(128, (budget // per_col_2p) // 128 * 128)
        td = min(td, d_pad)
        n_pad = _round_up(n, tn)
        xp = x2
        if d_pad != d:
            xp = jnp.pad(xp, ((0, 0), (0, d_pad - d)))            # dummy lanes, sliced off
        if n_pad != n:
            xp = jnp.pad(xp, ((0, n_pad - n), (0, 0)),
                         constant_values=-jnp.inf)                # exp(-inf)=0: no effect on stats
        out = _two_pass(xp, n_pad, d_pad, tn, td, budget)
        out = out[:n, :d]

    return out.reshape(orig_shape)


# ---------------------------------------------------------------------------
# demo / self-check
# ---------------------------------------------------------------------------
def _reference(x):
    x_max = jnp.max(x, axis=0, keepdims=True)
    x_exp = jnp.exp(x - x_max)
    return x_exp / jnp.sum(x_exp, axis=0, keepdims=True)


if __name__ == "__main__":
    key = jax.random.PRNGKey(0)
    k1, k2, k3 = jax.random.split(key, 3)

    # Case 1: module-like small shape, softmax over dim=0 (single-pass, single block).
    x1 = jax.random.normal(k1, (8, 256), dtype=jnp.float32)
    out1 = jax.block_until_ready(softmax_stable(x1))
    assert out1.shape == x1.shape and out1.dtype == x1.dtype
    assert jnp.allclose(out1, _reference(x1), atol=1e-6, rtol=1e-6)
    assert jnp.allclose(jnp.sum(out1, axis=0), 1.0, atol=1e-5)

    # Case 2: D not a multiple of 128 (exercises lane padding), single-pass path.
    x2 = jax.random.normal(k2, (16, 200), dtype=jnp.float32)
    out2 = jax.block_until_ready(softmax_stable(x2))
    assert out2.shape == x2.shape
    assert jnp.allclose(out2, _reference(x2), atol=1e-6, rtol=1e-6)
    assert jnp.allclose(jnp.sum(out2, axis=0), 1.0, atol=1e-5)

    # Case 3: force the tall-N two-pass path (online stats + normalize kernels).
    x3 = jax.random.normal(k3, (96, 200), dtype=jnp.float32)
    out3 = jax.block_until_ready(softmax_stable(x3, force_two_pass=True, tile_n=32))
    assert out3.shape == x3.shape
    assert jnp.allclose(out3, _reference(x3), atol=1e-5, rtol=1e-5)
    assert jnp.allclose(jnp.sum(out3, axis=0), 1.0, atol=1e-4)

    print("KERNEL_OK")
</pallas_src>

<mosaic_0001>
module attributes {stable_mosaic.version = 11 : i64} {
  func.func @_softmax_kernel(%arg0: i32, %arg1: memref<8x256xf32, #tpu.memory_space<vmem>>, %arg2: memref<8x256xf32, #tpu.memory_space<vmem>>) attributes {dimension_semantics = [#tpu.dimension_semantics<parallel>], iteration_bounds = array<i64: 1>, scalar_prefetch = 0 : i64, scratch_operands = 0 : i64, tpu.core_type = #tpu.core_type<tc>, window_params = [{transform_indices = @transform_0, window_bounds = array<i64: 8, 256>}, {transform_indices = @transform_1, window_bounds = array<i64: 8, 256>}]} {
    %c0 = arith.constant 0 : index
    %c0_0 = arith.constant 0 : index
    %0 = vector.load %arg1[%c0, %c0_0] : memref<8x256xf32, #tpu.memory_space<vmem>>, vector<8x256xf32>
    %cst = arith.constant dense<0xFF800000> : vector<256xf32>
    %1 = vector.multi_reduction <maximumf>, %0, %cst [0] : vector<8x256xf32> to vector<256xf32>
    %2 = vector.shape_cast %1 : vector<256xf32> to vector<1x256xf32>
    %3 = vector.broadcast %2 : vector<1x256xf32> to vector<8x256xf32>
    %4 = arith.subf %0, %3 : vector<8x256xf32>
    %5 = math.exp %4 : vector<8x256xf32>
    %c0_1 = arith.constant 0 : index
    %c0_2 = arith.constant 0 : index
    %6 = vector.load %arg2[%c0_1, %c0_2] : memref<8x256xf32, #tpu.memory_space<vmem>>, vector<8x256xf32>
    tpu.vector_store %arg2[%c0_1, %c0_2], %5 {strides = array<i32>} : memref<8x256xf32, #tpu.memory_space<vmem>>, vector<8x256xf32>,
    %c0_3 = arith.constant 0 : index
    %c0_4 = arith.constant 0 : index
    %7 = vector.load %arg2[%c0_3, %c0_4] : memref<8x256xf32, #tpu.memory_space<vmem>>, vector<8x256xf32>
    %cst_5 = arith.constant dense<0.000000e+00> : vector<256xf32>
    %8 = vector.multi_reduction <add>, %7, %cst_5 [0] : vector<8x256xf32> to vector<256xf32>
    %9 = vector.shape_cast %8 : vector<256xf32> to vector<1x256xf32>
    %10 = tpu.reciprocal %9 : vector<1x256xf32> -> vector<1x256xf32>
    %c0_6 = arith.constant 0 : index
    %c0_7 = arith.constant 0 : index
    %11 = vector.load %arg2[%c0_6, %c0_7] : memref<8x256xf32, #tpu.memory_space<vmem>>, vector<8x256xf32>
    %12 = vector.broadcast %10 : vector<1x256xf32> to vector<8x256xf32>
    %13 = arith.mulf %11, %12 : vector<8x256xf32>
    %c0_8 = arith.constant 0 : index
    %c0_9 = arith.constant 0 : index
    %14 = vector.load %arg2[%c0_8, %c0_9] : memref<8x256xf32, #tpu.memory_space<vmem>>, vector<8x256xf32>
    tpu.vector_store %arg2[%c0_8, %c0_9], %13 {strides = array<i32>} : memref<8x256xf32, #tpu.memory_space<vmem>>, vector<8x256xf32>,
    return
  }
  func.func @transform_0(%arg0: i32) -> (i32, i32) {
    %c0_i32 = arith.constant 0 : i32
    %c0_i32_0 = arith.constant 0 : i32
    return %c0_i32, %arg0 : i32, i32
  }
  func.func @transform_1(%arg0: i32) -> (i32, i32) {
    %c0_i32 = arith.constant 0 : i32
    %c0_i32_0 = arith.constant 0 : i32
    return %c0_i32, %arg0 : i32, i32
  }
}

</mosaic_0001>

<bundles_post_ra>
// kernel: tpu_custom_call.1
= control target key start
LH: loop header
LB: loop body
LE: loop exit
PB: predicated region body
PF: predicated region fallthrough
CT: control target
= control target key end

     0   :  { %6 = vsyncpa [#allocation3], 0  ;;  %s172_s0 = inlined_call_operand.hbm [shape: f32[8,256], index: 0, kind: input, shape index: {}]   ;;  %s173_s1 = inlined_call_operand.hbm [shape: f32[8,256], index: 1, kind: output, shape index: {}]  }
   0x1   :  { %7 = vsyncpa [#allocation4], 0  ;;  %s136_s6 = smov [#allocation2]   ;;  %s88_s10 = scalar_lea.hbm %s172_s0, 256 }
   0x2   :  { %s14_s7 = sshll.u32 %s136_s6, 4  ;;  %p89_p0 = scmp.ne.s32.totalorder %s172_s0, %s88_s10  ;;  %s15_s7 = int_to_ptr.vmem [resolvable:$true] %s14_s7 }
   0x3   :  { %p92_p1 = scmp.lt.u32.totalorder %s88_s10, %s172_s0 }
   0x5   :  { %p94_p2 = pnand %p92_p1, %p89_p0 }
   0x7   :  { %97 = shalt.err (!%p94_p2)
}
   0x8   :  { %s98_s15 = scalar_lea.vmem %s15_s7, 256  ;;  %p103_p4 = scmp.lt.s32.totalorder %s15_s7, %s15_s7 }
   0x9   :  { %p99_p3 = scmp.ne.s32.totalorder %s15_s7, %s98_s15  ;;  %p104_p5 = scmp.lt.s32.totalorder %s98_s15, %s98_s15 }
   0xb   :  { %p105_p6 = por %p104_p5, %p103_p4 }
   0xd   :  { %p106_p7 = pnand %p105_p6, %p99_p3 }
   0xf   :  { %109 = shalt.err (!%p106_p7)
}
  0x10   :  { %17 = dma.hbm_to_vmem [thread:$0]  %s172_s0, 256, %s15_s7, [#allocation3]  }
  0x11   :  { %132 = dma.done.wait [#allocation3], 256  }
  0x12   :  { %133 = vsyncadd [#allocation3], 4294967040  ;;  %v21_v0 = vld [vmem:[#allocation2] sm:$0xff]  ;;  %v22_v1 = vld [vmem:[#allocation2 + $0x8] sm:$0xff]  ;;  %s137_s0 = smov [#allocation5]  }
  0x13   :  { %v23_v2 = vrot.slane %v21_v0, 4  ;;  %v29_v3 = vrot.slane %v22_v1, 4  ;;  %s69_s18 = sshll.u32 %s137_s0, 4  ;;  %s70_s18 = int_to_ptr.vmem [resolvable:$true] %s69_s18 }
  0x14   :  { %s110_s19 = scalar_lea.vmem %s70_s18, 256  ;;  %p115_p9 = scmp.lt.s32.totalorder %s70_s18, %s70_s18 }
  0x15   :  { %v24_v4 = vmax.f32 %v21_v0, %v23_v2  ;;  %v30_v5 = vmax.f32 %v22_v1, %v29_v3  ;;  %p111_p8 = scmp.ne.s32.totalorder %s70_s18, %s110_s19  ;;  %p116_p10 = scmp.lt.s32.totalorder %s110_s19, %s110_s19 }
  0x17   :  { %v25_v6 = vrot.slane %v24_v4, 2  ;;  %v31_v7 = vrot.slane %v30_v5, 2  ;;  %p117_p11 = por %p116_p10, %p115_p9 }
  0x19   :  { %v26_v8 = vmax.f32 %v24_v4, %v25_v6  ;;  %v32_v9 = vmax.f32 %v30_v5, %v31_v7  ;;  %p118_p12 = pnand %p117_p11, %p111_p8 }
  0x1b   :  { %v27_v10 = vrot.slane %v26_v8, 1  ;;  %v33_v11 = vrot.slane %v32_v9, 1 }
  0x1d   :  { %v28_v12 = vmax.f32 %v26_v8, %v27_v10  ;;  %v34_v13 = vmax.f32 %v32_v9, %v33_v11 }
  0x1f   :  { %v35_v14 = vsub.f32 %v21_v0, %v28_v12  ;;  %v36_v15 = vsub.f32 %v22_v1, %v34_v13 }
  0x21   :  { %v37_v16 = vmul.f32 1.442695, %v35_v14  ;;  %v39_v17 = vmul.f32 1.442695, %v36_v15 }
  0x23   :  { %80 = vpow2.f32 %v37_v16 }
  0x24   :  { %82 = vpow2.f32 %v39_v17 }
  0x2d   :  { %v81_v18 = vpop.eup %80 }
  0x2e   :  { %v83_v19 = vpop.eup %82  ;;  %v45_v20 = vrot.slane %v81_v18, 4 }
  0x2f   :  { %v51_v21 = vrot.slane %v83_v19, 4 }
  0x30   :  { %v46_v22 = vadd.f32 %v81_v18, %v45_v20 }
  0x31   :  { %v52_v23 = vadd.f32 %v83_v19, %v51_v21 }
  0x32   :  { %v47_v24 = vrot.slane %v46_v22, 2 }
  0x33   :  { %v53_v25 = vrot.slane %v52_v23, 2 }
  0x34   :  { %v48_v26 = vadd.f32 %v47_v24, %v46_v22 }
  0x35   :  { %v54_v27 = vadd.f32 %v53_v25, %v52_v23 }
  0x36   :  { %v49_v28 = vrot.slane %v48_v26, 1 }
  0x37   :  { %v55_v29 = vrot.slane %v54_v27, 1 }
  0x38   :  { %v50_v30 = vadd.f32 %v49_v28, %v48_v26 }
  0x39   :  { %v56_v31 = vadd.f32 %v55_v29, %v54_v27 }
  0x3a   :  { %84 = vrcp.f32 %v50_v30 }
  0x3b   :  { %86 = vrcp.f32 %v56_v31 }
  0x44   :  { %v85_v32 = vpop.eup %84 }
  0x45   :  { %v87_v33 = vpop.eup %86  ;;  %v59_v34 = vmul.f32 %v85_v32, %v81_v18 }
  0x46   :  { %v60_v35 = vmul.f32 %v87_v33, %v83_v19 }
  0x47   :  { %61 = vst [vmem:[#allocation5] sm:$0xff] %v59_v34 }
  0x48   :  { %62 = vst [vmem:[#allocation5 + $0x8] sm:$0xff] %v60_v35 }
  0x49   :  { %121 = shalt.err (!%p118_p12)
}
  0x4a   :  { %s122_s22 = scalar_lea.hbm %s173_s1, 256 }
  0x4b   :  { %p123_p13 = scmp.ne.s32.totalorder %s173_s1, %s122_s22  ;;  %p126_p0 = scmp.lt.u32.totalorder %s122_s22, %s173_s1 }
  0x4d   :  { %p128_p1 = pnand %p126_p0, %p123_p13 }
  0x4f   :  { %131 = shalt.err (!%p128_p1)
}
  0x50   :  { %72 = dma.vmem_to_hbm [thread:$0]  %s70_s18, 256, %s173_s1, [#allocation4]  }
  0x51   :  { %134 = dma.done.wait [#allocation4], 256  }
  0x52   :  { %135 = vsyncadd [#allocation4], 4294967040 }
  0x53   :  { %76 = vsyncpa [#allocation3], 1 }
  0x54   :  { %77 = vsyncpa [#allocation4], 1 }

</bundles_post_ra>
